<compile_context>
chip_gen: v7x
topology: tpu7x:2x2x1
jax: 0.10.0
libtpu: 0.0.40
codegen_flags: <defaults>
</compile_context>

<pallas_src>
import jax
import jax.numpy as jnp
from jax.experimental import pallas as pl
from jax.experimental.pallas import tpu as pltpu


def _round_up(a, b):
    return ((a + b - 1) // b) * b


def _make_ffn_kernel(use_acc_scratch):
    def kernel(x_ref, w1_ref, b1_ref, w2_ref, b2_ref, o_ref, *scratch):
        # x_ref : (tm, Ep)   w1_ref: (Ep, th)   b1_ref: (1, th)
        # w2_ref: (th, Ep)   b2_ref: (1, Ep)    o_ref : (tm, Ep)
        # scratch[0] (only for non-f32 dtypes): (tm, Ep) f32 accumulator.
        h_step = pl.program_id(1)
        acc = scratch[0] if use_acc_scratch else o_ref

        # Init the resident accumulator with the (broadcast) output bias.
        @pl.when(h_step == 0)
        def _init():
            acc[...] = jnp.broadcast_to(
                b2_ref[...].astype(jnp.float32), acc.shape)

        # First linear on this H slice: native-dtype MXU operands, f32 result.
        h = jnp.dot(x_ref[...], w1_ref[...], preferred_element_type=jnp.float32)
        h = h + b1_ref[...].astype(jnp.float32)

        # tanh-approx GELU (matches the PyTorch module), computed in f32.
        c = jnp.float32(0.7978845608028654)  # sqrt(2/pi)
        g = 0.5 * h * (1.0 + jnp.tanh(c * (h + 0.044715 * (h * h * h))))

        # Second linear for this H slice, accumulated into the resident tile.
        acc[...] += jnp.dot(g.astype(w2_ref.dtype), w2_ref[...],
                            preferred_element_type=jnp.float32)

        if use_acc_scratch:
            @pl.when(h_step == pl.num_programs(1) - 1)
            def _finalize():
                o_ref[...] = acc[...].astype(o_ref.dtype)

    return kernel


def _device_defaults():
    """Per-generation tile defaults from the HBM/MXU roofline balance point."""
    kind = ""
    try:
        kind = jax.devices()[0].device_kind.lower()
    except Exception:
        pass
    # Conservative VMEM fallback if the trace-time query is unavailable.
    vmem_cap = (64 << 20) if "v7" in kind else (128 << 20)
    try:
        vmem_cap = int(pltpu.get_tpu_info().vmem_capacity_bytes)
    except Exception:
        pass
    two_tc = "v7" in kind
    if "v7" in kind:
        tm, th = 512, 512      # 996 TF/s vs 3.2 TB/s -> tm~320 balance; 64 MiB VMEM
    elif "v6" in kind:
        tm, th = 768, 512      # 918 TF/s vs ~1.4 TB/s -> tm~650 balance; 128 MiB VMEM
    elif "v5" in kind:
        tm, th = 256, 1024     # 197 TF/s vs ~0.82 TB/s -> tm~240; big th cuts acc RMW
    else:
        tm, th = 256, 512
    return tm, th, vmem_cap, two_tc


def _working_set_bytes(tm, th, Ep, itemsize, use_acc_scratch):
    """Per-step VMEM working set: double-buffered blocks + scratch + h/g temps."""
    ws = 2 * tm * Ep * itemsize          # x blocks
    ws += 2 * Ep * th * itemsize         # w1 blocks
    ws += 2 * th * itemsize              # b1 blocks
    ws += 2 * th * Ep * itemsize         # w2 blocks
    ws += 2 * Ep * itemsize              # b2 blocks
    ws += 2 * tm * Ep * itemsize         # output blocks
    if use_acc_scratch:
        ws += tm * Ep * 4                # resident f32 accumulator scratch
    ws += 2 * tm * th * 4                # (tm, th) f32 h and g intermediates
    return ws


def feedforward_pallas(x, w1, b1, w2, b2, *, tm=None, th=None,
                       vmem_limit_bytes=None):
    """x: [B, S, E] -> [B, S, E].  w1: [E, H], b1: [H], w2: [H, E], b2: [E]."""
    B, S, E = x.shape
    E_w, H = w1.shape
    assert E_w == E and w2.shape == (H, E) and b1.shape == (H,) and b2.shape == (E,)
    M = B * S
    dtype = x.dtype
    itemsize = jnp.dtype(dtype).itemsize
    # f32 inputs accumulate directly into the resident output block.
    use_acc_scratch = dtype != jnp.float32

    tm_def, th_def, vmem_cap, two_tc = _device_defaults()
    if tm is None:
        tm = tm_def
    if th is None:
        th = th_def

    # Lane-dense padding of the channel dim (multiple of 128).
    Ep = _round_up(E, 128)

    # --- M tile: multiple of 8, no larger than needed. ---
    tm = max(8, min(_round_up(tm, 8), _round_up(M, 8)))
    if two_tc and M > 8:
        # Ensure >= 2 M tiles so the "parallel" axis shards across both v7x TCs.
        tm = min(tm, _round_up(-(-M // 2), 8))

    # --- H tile: multiple of 128, shrunk first to fit the device VMEM budget. ---
    th = max(128, min(_round_up(th, 128), _round_up(H, 128)))
    budget = max(16 << 20, vmem_cap - (8 << 20))
    while (_working_set_bytes(tm, th, Ep, itemsize, use_acc_scratch) > budget
           and th > 128):
        th = max(128, ((th // 2) // 128) * 128)
    # Last resort only (review: prefer never shrinking tm / Ep).
    while (_working_set_bytes(tm, th, Ep, itemsize, use_acc_scratch) > budget
           and tm > 8):
        tm = max(8, ((tm // 2) // 8) * 8)

    Hp = _round_up(H, th)
    Mp = _round_up(M, tm)

    # Pad only when actually needed.  For repeated calls with the same weights,
    # cache w1p/b1p/w2p/b2p outside this function to avoid the per-call copy.
    x2d = x.reshape(M, E)
    if (Mp, Ep) != (M, E):
        x2d = jnp.pad(x2d, ((0, Mp - M), (0, Ep - E)))
    w1p = w1 if (Ep, Hp) == (E, H) else jnp.pad(w1, ((0, Ep - E), (0, Hp - H)))
    b1p = b1.reshape(1, H)
    if Hp != H:
        b1p = jnp.pad(b1p, ((0, 0), (0, Hp - H)))
    w2p = w2 if (Hp, Ep) == (H, E) else jnp.pad(w2, ((0, Hp - H), (0, Ep - E)))
    b2p = b2.reshape(1, E)
    if Ep != E:
        b2p = jnp.pad(b2p, ((0, 0), (0, Ep - E)))

    grid = (Mp // tm, Hp // th)
    num_m_tiles = grid[0]

    ws = _working_set_bytes(tm, th, Ep, itemsize, use_acc_scratch)
    if vmem_limit_bytes is None:
        vmem_limit_bytes = int(min(max(32 << 20, ws + (8 << 20)),
                                   vmem_cap - (2 << 20)))

    cost = pl.CostEstimate(
        flops=4 * Mp * Ep * Hp,              # two matmuls: 2*Mp*Ep*Hp each
        transcendentals=Mp * Hp,             # tanh
        bytes_accessed=int(
            2 * Mp * Ep * itemsize                      # x in + out write
            + num_m_tiles * 2 * Ep * Hp * itemsize      # weights restreamed per M tile
            + num_m_tiles * (Hp + Ep) * itemsize),      # biases restreamed per M tile
    )

    scratch_shapes = ([pltpu.VMEM((tm, Ep), jnp.float32)]
                      if use_acc_scratch else [])

    out2d = pl.pallas_call(
        _make_ffn_kernel(use_acc_scratch),
        out_shape=jax.ShapeDtypeStruct((Mp, Ep), dtype),
        grid_spec=pltpu.PrefetchScalarGridSpec(
            num_scalar_prefetch=0,
            grid=grid,
            in_specs=[
                pl.BlockSpec((tm, Ep), lambda i, h: (i, 0)),   # x tile
                pl.BlockSpec((Ep, th), lambda i, h: (0, h)),   # w1 H-slice
                pl.BlockSpec((1, th), lambda i, h: (0, h)),    # b1 H-slice
                pl.BlockSpec((th, Ep), lambda i, h: (h, 0)),   # w2 H-slice
                pl.BlockSpec((1, Ep), lambda i, h: (0, 0)),    # b2
            ],
            out_specs=pl.BlockSpec((tm, Ep), lambda i, h: (i, 0)),
            scratch_shapes=scratch_shapes,
        ),
        compiler_params=pltpu.CompilerParams(
            dimension_semantics=("parallel", "arbitrary"),
            vmem_limit_bytes=vmem_limit_bytes,
        ),
        cost_estimate=cost,
    )(x2d, w1p, b1p, w2p, b2p)

    return out2d[:M, :E].reshape(B, S, E)


def _reference(x, w1, b1, w2, b2):
    hp = jax.lax.Precision.HIGHEST
    h = jnp.einsum("bse,eh->bsh", x, w1, precision=hp) + b1
    c = jnp.sqrt(2.0 / jnp.pi)
    g = 0.5 * h * (1.0 + jnp.tanh(c * (h + 0.044715 * h ** 3)))
    return jnp.einsum("bsh,he->bse", g, w2, precision=hp) + b2


def _make_params(key, E, H, dtype=jnp.float32):
    k1, k2, k3, k4 = jax.random.split(key, 4)
    bound1 = 1.0 / jnp.sqrt(E)
    bound2 = 1.0 / jnp.sqrt(H)
    w1 = jax.random.uniform(k1, (E, H), minval=-bound1, maxval=bound1, dtype=dtype)
    b1 = jax.random.uniform(k2, (H,), minval=-bound1, maxval=bound1, dtype=dtype)
    w2 = jax.random.uniform(k3, (H, E), minval=-bound2, maxval=bound2, dtype=dtype)
    b2 = jax.random.uniform(k4, (E,), minval=-bound2, maxval=bound2, dtype=dtype)
    return w1, b1, w2, b2


if __name__ == "__main__":
    key = jax.random.PRNGKey(0)

    # Case 1: the module's small config (emb_dim=32 -> hidden=128), float32
    # (exercises the accumulate-directly-into-output path, no f32 scratch).
    B, S, E = 2, 8, 32
    H = 4 * E
    kx, kp = jax.random.split(key)
    x = jax.random.normal(kx, (B, S, E), dtype=jnp.float32)
    w1, b1, w2, b2 = _make_params(kp, E, H)
    out = jax.block_until_ready(feedforward_pallas(x, w1, b1, w2, b2))
    ref = _reference(x, w1, b1, w2, b2)
    assert out.shape == (B, S, E)
    assert jnp.allclose(out, ref, atol=2e-3, rtol=2e-3), "mismatch (case 1)"

    # Case 2: padding / remainder path (E, H, M not multiples of 128 / 8).
    B2, S2, E2 = 2, 5, 48
    H2 = 4 * E2
    kx2, kp2 = jax.random.split(jax.random.PRNGKey(1))
    x2 = jax.random.normal(kx2, (B2, S2, E2), dtype=jnp.float32)
    w1b, b1b, w2b, b2b = _make_params(kp2, E2, H2)
    out2 = jax.block_until_ready(feedforward_pallas(x2, w1b, b1b, w2b, b2b))
    ref2 = _reference(x2, w1b, b1b, w2b, b2b)
    assert out2.shape == (B2, S2, E2)
    assert jnp.allclose(out2, ref2, atol=2e-3, rtol=2e-3), "mismatch (case 2)"

    # Case 3: bfloat16 inputs (exercises the f32 VMEM scratch accumulator path).
    xb = x.astype(jnp.bfloat16)
    w1c, b1c, w2c, b2c = (a.astype(jnp.bfloat16) for a in (w1, b1, w2, b2))
    out3 = jax.block_until_ready(feedforward_pallas(xb, w1c, b1c, w2c, b2c))
    ref3 = _reference(xb.astype(jnp.float32), w1c.astype(jnp.float32),
                      b1c.astype(jnp.float32), w2c.astype(jnp.float32),
                      b2c.astype(jnp.float32))
    assert out3.shape == (B, S, E) and out3.dtype == jnp.bfloat16
    assert jnp.allclose(out3.astype(jnp.float32), ref3, atol=5e-2, rtol=5e-2), \
        "mismatch (case 3, bf16)"

    print("KERNEL_OK")
</pallas_src>

<mosaic_0001>
module attributes {stable_mosaic.version = 11 : i64} {
  func.func @kernel(%arg0: i32, %arg1: i32, %arg2: memref<16x128xf32, #tpu.memory_space<vmem>>, %arg3: memref<128x128xf32, #tpu.memory_space<vmem>>, %arg4: memref<1x128xf32, #tpu.memory_space<vmem>>, %arg5: memref<128x128xf32, #tpu.memory_space<vmem>>, %arg6: memref<1x128xf32, #tpu.memory_space<vmem>>, %arg7: memref<16x128xf32, #tpu.memory_space<vmem>>) attributes {dimension_semantics = [#tpu.dimension_semantics<parallel>, #tpu.dimension_semantics<arbitrary>], iteration_bounds = array<i64: 1, 1>, scalar_prefetch = 0 : i64, scratch_operands = 0 : i64, tpu.core_type = #tpu.core_type<tc>, window_params = [{transform_indices = @transform_0, window_bounds = array<i64: 16, 128>}, {transform_indices = @transform_1, window_bounds = array<i64: 128, 128>}, {transform_indices = @transform_2, window_bounds = array<i64: 1, 128>}, {transform_indices = @transform_3, window_bounds = array<i64: 128, 128>}, {pipeline_mode = #tpu.pipeline_mode<synchronous>, transform_indices = @transform_4, window_bounds = array<i64: 1, 128>}, {transform_indices = @transform_5, window_bounds = array<i64: 16, 128>}]} {
    %c0_i32 = arith.constant 0 : i32
    %0 = arith.cmpi eq, %arg1, %c0_i32 : i32
    %1 = arith.extui %0 : i1 to i32
    %c0_i32_0 = arith.constant 0 : i32
    %2 = arith.cmpi ne, %1, %c0_i32_0 : i32
    scf.if %2 {
      %c0_17 = arith.constant 0 : index
      %c0_18 = arith.constant 0 : index
      %27 = vector.load %arg6[%c0_17, %c0_18] : memref<1x128xf32, #tpu.memory_space<vmem>>, vector<1x128xf32>
      %28 = vector.shape_cast %27 : vector<1x128xf32> to vector<1x128xf32>
      %29 = vector.broadcast %28 : vector<1x128xf32> to vector<16x128xf32>
      %c0_19 = arith.constant 0 : index
      %c0_20 = arith.constant 0 : index
      %30 = vector.load %arg7[%c0_19, %c0_20] : memref<16x128xf32, #tpu.memory_space<vmem>>, vector<16x128xf32>
      tpu.vector_store %arg7[%c0_19, %c0_20], %29 {strides = array<i32>} : memref<16x128xf32, #tpu.memory_space<vmem>>, vector<16x128xf32>,
    } else {
    }
    %c0 = arith.constant 0 : index
    %c0_1 = arith.constant 0 : index
    %3 = vector.load %arg2[%c0, %c0_1] : memref<16x128xf32, #tpu.memory_space<vmem>>, vector<16x128xf32>
    %c0_2 = arith.constant 0 : index
    %c0_3 = arith.constant 0 : index
    %4 = vector.load %arg3[%c0_2, %c0_3] : memref<128x128xf32, #tpu.memory_space<vmem>>, vector<128x128xf32>
    %cst = arith.constant dense<0.000000e+00> : vector<16x128xf32>
    %5 = tpu.matmul %3, %4, %cst {dimension_numbers = #tpu.dot_dimension_numbers<[1], [0], [0], [1], [0, 0, 1, 1], [], []>} : vector<16x128xf32>, vector<128x128xf32>, vector<16x128xf32> -> vector<16x128xf32>
    %c0_4 = arith.constant 0 : index
    %c0_5 = arith.constant 0 : index
    %6 = vector.load %arg4[%c0_4, %c0_5] : memref<1x128xf32, #tpu.memory_space<vmem>>, vector<1x128xf32>
    %7 = vector.broadcast %6 : vector<1x128xf32> to vector<16x128xf32>
    %8 = arith.addf %5, %7 : vector<16x128xf32>
    %cst_6 = arith.constant 5.000000e-01 : f32
    %9 = vector.broadcast %cst_6 : f32 to vector<16x128xf32>
    %10 = arith.mulf %9, %8 : vector<16x128xf32>
    %11 = arith.mulf %8, %8 : vector<16x128xf32>
    %12 = arith.mulf %11, %8 : vector<16x128xf32>
    %cst_7 = arith.constant 4.471500e-02 : f32
    %13 = vector.broadcast %cst_7 : f32 to vector<16x128xf32>
    %14 = arith.mulf %13, %12 : vector<16x128xf32>
    %15 = arith.addf %8, %14 : vector<16x128xf32>
    %cst_8 = arith.constant 0.797884583 : f32
    %16 = vector.broadcast %cst_8 : f32 to vector<16x128xf32>
    %17 = arith.mulf %16, %15 : vector<16x128xf32>
    %18 = math.tanh %17 : vector<16x128xf32>
    %cst_9 = arith.constant 1.000000e+00 : f32
    %19 = vector.broadcast %cst_9 : f32 to vector<16x128xf32>
    %20 = arith.addf %19, %18 : vector<16x128xf32>
    %21 = arith.mulf %10, %20 : vector<16x128xf32>
    %c0_10 = arith.constant 0 : index
    %c0_11 = arith.constant 0 : index
    %22 = vector.load %arg7[%c0_10, %c0_11] : memref<16x128xf32, #tpu.memory_space<vmem>>, vector<16x128xf32>
    %c0_12 = arith.constant 0 : index
    %c0_13 = arith.constant 0 : index
    %23 = vector.load %arg5[%c0_12, %c0_13] : memref<128x128xf32, #tpu.memory_space<vmem>>, vector<128x128xf32>
    %cst_14 = arith.constant dense<0.000000e+00> : vector<16x128xf32>
    %24 = tpu.matmul %21, %23, %cst_14 {dimension_numbers = #tpu.dot_dimension_numbers<[1], [0], [0], [1], [0, 0, 1, 1], [], []>} : vector<16x128xf32>, vector<128x128xf32>, vector<16x128xf32> -> vector<16x128xf32>
    %25 = arith.addf %22, %24 : vector<16x128xf32>
    %c0_15 = arith.constant 0 : index
    %c0_16 = arith.constant 0 : index
    %26 = vector.load %arg7[%c0_15, %c0_16] : memref<16x128xf32, #tpu.memory_space<vmem>>, vector<16x128xf32>
    tpu.vector_store %arg7[%c0_15, %c0_16], %25 {strides = array<i32>} : memref<16x128xf32, #tpu.memory_space<vmem>>, vector<16x128xf32>,
    return
  }
  func.func @transform_0(%arg0: i32, %arg1: i32) -> (i32, i32) {
    %c0_i32 = arith.constant 0 : i32
    %c0_i32_0 = arith.constant 0 : i32
    return %arg0, %c0_i32 : i32, i32
  }
  func.func @transform_1(%arg0: i32, %arg1: i32) -> (i32, i32) {
    %c0_i32 = arith.constant 0 : i32
    %c0_i32_0 = arith.constant 0 : i32
    return %c0_i32, %arg1 : i32, i32
  }
  func.func @transform_2(%arg0: i32, %arg1: i32) -> (i32, i32) {
    %c0_i32 = arith.constant 0 : i32
    %c0_i32_0 = arith.constant 0 : i32
    return %c0_i32, %arg1 : i32, i32
  }
  func.func @transform_3(%arg0: i32, %arg1: i32) -> (i32, i32) {
    %c0_i32 = arith.constant 0 : i32
    %c0_i32_0 = arith.constant 0 : i32
    return %arg1, %c0_i32 : i32, i32
  }
  func.func @transform_4(%arg0: i32, %arg1: i32) -> (i32, i32) {
    %c0_i32 = arith.constant 0 : i32
    %c0_i32_0 = arith.constant 0 : i32
    %c0_i32_1 = arith.constant 0 : i32
    return %c0_i32, %c0_i32_0 : i32, i32
  }
  func.func @transform_5(%arg0: i32, %arg1: i32) -> (i32, i32) {
    %c0_i32 = arith.constant 0 : i32
    %c0_i32_0 = arith.constant 0 : i32
    return %arg0, %c0_i32 : i32, i32
  }
}

</mosaic_0001>

<bundles_post_ra>
// kernel: tpu_custom_call.1
= control target key start
LH: loop header
LB: loop body
LE: loop exit
PB: predicated region body
PF: predicated region fallthrough
CT: control target
= control target key end

     0   :  { %10 = vsyncpa [#allocation3], 0  ;;  %s693_s0 = inlined_call_operand.hbm [shape: f32[16,128], index: 0, kind: input, shape index: {}]   ;;  %s694_s1 = inlined_call_operand.hbm [shape: f32[128,128], index: 1, kind: input, shape index: {}]   ;;  %s695_s2 = inlined_call_operand.vmem [shape: f32[1,128], index: 2, kind: input, shape index: {}]   ;;  %s696_s3 = inlined_call_operand.hbm [shape: f32[128,128], index: 3, kind: input, shape index: {}]   ;;  %s697_s4 = inlined_call_operand.vmem [shape: f32[1,128], index: 4, kind: input, shape index: {}]   ;;  %s698_s5 = inlined_call_operand.hbm [shape: f32[16,128], index: 5, kind: output, shape index: {}]  }
   0x1   :  { %11 = vsyncpa [#allocation6], 0 }
   0x2   :  { %12 = vsyncpa [#allocation4], 0  ;;  %s584_s18 = smov [#allocation5]   ;;  %s585_s20 = smov [#allocation2]  }
   0x3   :  { %s30_s19 = sshll.u32 %s584_s18, 4  ;;  %s18_s21 = sshll.u32 %s585_s20, 4  ;;  %s31_s19 = int_to_ptr.vmem [resolvable:$true] %s30_s19  ;;  %s620_s21 = int_to_ptr.vmem [resolvable:$true] %s18_s21 }
   0x4   :  { %s490_s24 = scalar_lea.hbm %s694_s1, 2048 }
   0x5   :  { %p491_p0 = scmp.ne.s32.totalorder %s694_s1, %s490_s24  ;;  %p494_p1 = scmp.lt.u32.totalorder %s490_s24, %s694_s1 }
   0x7   :  { %p496_p2 = pnand %p494_p1, %p491_p0 }
   0x9   :  { %499 = shalt.err (!%p496_p2)
}
   0xa   :  { %s500_s29 = scalar_lea.vmem %s31_s19, 2048  ;;  %p505_p4 = scmp.lt.s32.totalorder %s31_s19, %s31_s19 }
   0xb   :  { %p501_p3 = scmp.ne.s32.totalorder %s31_s19, %s500_s29  ;;  %p506_p5 = scmp.lt.s32.totalorder %s500_s29, %s500_s29 }
   0xd   :  { %p507_p6 = por %p506_p5, %p505_p4 }
   0xf   :  { %p508_p7 = pnand %p507_p6, %p501_p3 }
  0x11   :  { %511 = shalt.err (!%p508_p7)
}
  0x12   :  { %s586_s30 = smov 128   ;;  %s587_s6 = smov 8  }
  0x13   :  { %36 = dma.hbm_to_vmem [thread:$0]  %s694_s1, 2048, %s31_s19, [#allocation6], %s586_s30, %s586_s30, %s587_s6  }
  0x14   :  { %s512_s11 = scalar_lea.hbm %s693_s0, 256 }
  0x15   :  { %p513_p8 = scmp.ne.s32.totalorder %s693_s0, %s512_s11  ;;  %p516_p9 = scmp.lt.u32.totalorder %s512_s11, %s693_s0 }
  0x17   :  { %p518_p10 = pnand %p516_p9, %p513_p8 }
  0x19   :  { %521 = shalt.err (!%p518_p10)
}
  0x1a   :  { %s522_s16 = scalar_lea.vmem %s620_s21, 256  ;;  %p527_p12 = scmp.lt.s32.totalorder %s620_s21, %s620_s21 }
  0x1b   :  { %p523_p11 = scmp.ne.s32.totalorder %s620_s21, %s522_s16  ;;  %p528_p13 = scmp.lt.s32.totalorder %s522_s16, %s522_s16 }
  0x1d   :  { %p529_p0 = por %p528_p13, %p527_p12 }
  0x1f   :  { %p530_p1 = pnand %p529_p0, %p523_p11 }
  0x21   :  { %533 = shalt.err (!%p530_p1)
}
  0x22   :  { %24 = dma.hbm_to_vmem [thread:$0]  %s693_s0, 256, %s620_s21, [#allocation3], %s586_s30, %s586_s30, %s587_s6  }
  0x23   :  { %s588_s18 = smov [#allocation7]   ;;  %s534_s23 = scalar_lea.hbm %s696_s3, 2048 }
  0x24   :  { %s44_s19 = sshll.u32 %s588_s18, 4  ;;  %p535_p2 = scmp.ne.s32.totalorder %s696_s3, %s534_s23  ;;  %s45_s19 = int_to_ptr.vmem [resolvable:$true] %s44_s19 }
  0x25   :  { %p538_p3 = scmp.lt.u32.totalorder %s534_s23, %s696_s3 }
  0x27   :  { %p540_p4 = pnand %p538_p3, %p535_p2 }
  0x29   :  { %543 = shalt.err (!%p540_p4)
}
  0x2a   :  { %s544_s28 = scalar_lea.vmem %s45_s19, 2048  ;;  %p549_p6 = scmp.lt.s32.totalorder %s45_s19, %s45_s19 }
  0x2b   :  { %p545_p5 = scmp.ne.s32.totalorder %s45_s19, %s544_s28  ;;  %p550_p7 = scmp.lt.s32.totalorder %s544_s28, %s544_s28 }
  0x2d   :  { %p551_p8 = por %p550_p7, %p549_p6 }
  0x2f   :  { %p552_p9 = pnand %p551_p8, %p545_p5 }
  0x31   :  { %555 = shalt.err (!%p552_p9)
}
  0x32   :  { %50 = dma.hbm_to_vmem [thread:$0]  %s696_s3, 2048, %s45_s19, [#allocation6], %s586_s30, %s586_s30, %s587_s6  }
  0x33   :  { %578 = dma.done.wait [#allocation3], 256  }
  0x34   :  { %579 = vsyncadd [#allocation3], 4294967040 }
  0x35   :  { %580 = dma.done.wait [#allocation6], 4096  }
  0x36   :  { %581 = vsyncadd [#allocation6], 4294963200  ;;  %v77_v0 = vld [vmem:[#allocation5] sm:$0xff]  ;;  %v78_v1 = vld [vmem:[#allocation5 + $0x8] sm:$0xff]  ;;  %s589_s8 = smov [#allocation8]  }
  0x37   :  { %v79_v2 = vld [vmem:[#allocation5 + $0x10] sm:$0xff]  ;;  %v416_v3 = vpack.c.bf16 %v78_v1, %v77_v0  ;;  %v80_v4 = vld [vmem:[#allocation5 + $0x18] sm:$0xff]  ;;  %v81_v6 = vld [vmem:[#allocation5 + $0x20] sm:$0xff]  ;;  %s295_s9 = sshll.u32 %s589_s8, 4  ;;  %s296_s9 = int_to_ptr.vmem [resolvable:$true] %s295_s9 }
  0x38   :  { %v420_v5 = vpack.c.bf16 %v80_v4, %v79_v2  ;;  %v82_v7 = vld [vmem:[#allocation5 + $0x28] sm:$0xff]  ;;  %v83_v9 = vld [vmem:[#allocation5 + $0x30] sm:$0xff]  ;;  %v84_v11 = vld [vmem:[#allocation5 + $0x38] sm:$0xff]  ;;  %s556_s10 = scalar_lea.vmem %s296_s9, 256  ;;  %p561_p11 = scmp.lt.s32.totalorder %s296_s9, %s296_s9 }
  0x39   :  { %417 = vmatprep.subr.bf16.mxu0 %v416_v3  ;;  %v424_v8 = vpack.c.bf16 %v82_v7, %v81_v6  ;;  %v75_v10 = vld [vmem:[#allocation2] sm:$0xff]  ;;  %v195_v12 = vld [vmem:[#allocation7] sm:$0xff]  ;;  %v196_v13 = vld [vmem:[#allocation7 + $0x8] sm:$0xff]  ;;  %v428_v15 = vpack.c.bf16 %v84_v11, %v83_v9  ;;  %p557_p10 = scmp.ne.s32.totalorder %s296_s9, %s556_s10  ;;  %p562_p12 = scmp.lt.s32.totalorder %s556_s10, %s556_s10 }
  0x3a   :  { %419 = vmatpush3.bf16.msra.mxu0 %v416_v3  ;;  %378 = vmatprep.mubr.f32.mxu0 %v75_v10  ;;  %v448_v14 = vpack.c.bf16 %v196_v13, %v195_v12  ;;  %v85_v16 = vld [vmem:[#allocation5 + $0x40] sm:$0xff]  ;;  %v86_v17 = vld [vmem:[#allocation5 + $0x48] sm:$0xff]  ;;  %v87_v19 = vld [vmem:[#allocation5 + $0x50] sm:$0xff] }
  0x3b   :  { %421 = vmatprep.subr.bf16.mxu0 %v420_v5  ;;  %v432_v18 = vpack.c.bf16 %v86_v17, %v85_v16  ;;  %v88_v20 = vld [vmem:[#allocation5 + $0x58] sm:$0xff]  ;;  %v89_v22 = vld [vmem:[#allocation5 + $0x60] sm:$0xff]  ;;  %v90_v23 = vld [vmem:[#allocation5 + $0x68] sm:$0xff]  ;;  %p563_p13 = por %p562_p12, %p561_p11 }
  0x3c   :  { %449 = vmatprep.subr.bf16.mxu1 %v448_v14  ;;  %v436_v21 = vpack.c.bf16 %v88_v20, %v87_v19  ;;  %v440_v24 = vpack.c.bf16 %v90_v23, %v89_v22  ;;  %v91_v25 = vld [vmem:[#allocation5 + $0x70] sm:$0xff]  ;;  %v92_v26 = vld [vmem:[#allocation5 + $0x78] sm:$0xff]  ;;  %v199_v32 = vld [vmem:[#allocation7 + $0x20] sm:$0xff] }
  0x3d   :  { %451 = vmatpush3.bf16.msra.mxu1 %v448_v14  ;;  %v444_v27 = vpack.c.bf16 %v92_v26, %v91_v25  ;;  %v76_v28 = vld [vmem:[#allocation2 + $0x8] sm:$0xff]  ;;  %v197_v29 = vld [vmem:[#allocation7 + $0x10] sm:$0xff]  ;;  %v200_v33 = vld [vmem:[#allocation7 + $0x28] sm:$0xff]  ;;  %p564_p0 = pnand %p563_p13, %p557_p10 }
  0x3e   :  { %423 = vmatpush3.bf16.msra.mxu0 %v420_v5  ;;  %v198_v30 = vld [vmem:[#allocation7 + $0x18] sm:$0xff]  ;;  %v456_v34 = vpack.c.bf16 %v200_v33, %v199_v32  ;;  %v201_v35 = vld [vmem:[#allocation7 + $0x30] sm:$0xff]  ;;  %v203_v38 = vld [vmem:[#allocation7 + $0x40] sm:$0xff] }
  0x3f   :  { %425 = vmatprep.subr.bf16.mxu0 %v424_v8  ;;  %v452_v31 = vpack.c.bf16 %v198_v30, %v197_v29  ;;  %v202_v36 = vld [vmem:[#allocation7 + $0x38] sm:$0xff]  ;;  %v204_v39 = vld [vmem:[#allocation7 + $0x48] sm:$0xff]  ;;  %v205_v40 = vld [vmem:[#allocation7 + $0x50] sm:$0xff] }
  0x40   :  { %v460_v37 = vpack.c.bf16 %v202_v36, %v201_v35  ;;  %v464_v41 = vpack.c.bf16 %v204_v39, %v203_v38  ;;  %v206_v42 = vld [vmem:[#allocation7 + $0x58] sm:$0xff]  ;;  %v207_v44 = vld [vmem:[#allocation7 + $0x60] sm:$0xff]  ;;  %v208_v45 = vld [vmem:[#allocation7 + $0x68] sm:$0xff] }
  0x41   :  { %453 = vmatprep.subr.bf16.mxu1 %v452_v31  ;;  %v468_v43 = vpack.c.bf16 %v206_v42, %v205_v40  ;;  %v472_v46 = vpack.c.bf16 %v208_v45, %v207_v44  ;;  %v209_v47 = vld [vmem:[#allocation7 + $0x70] sm:$0xff]  ;;  %v210_v48 = vld [vmem:[#allocation7 + $0x78] sm:$0xff] }
  0x42   :  { %427 = vmatpush3.bf16.msra.mxu0 %v424_v8  ;;  %455 = vmatpush3.bf16.msra.mxu1 %v452_v31  ;;  %v476_v49 = vpack.c.bf16 %v210_v48, %v209_v47  ;;  %v309_v50 = vld [vmem:[%s695_s2] ss:$0 sm:$0xff] }
  0x43   :  { %429 = vmatprep.subr.bf16.mxu0 %v428_v15  ;;  %457 = vmatprep.subr.bf16.mxu1 %v456_v34  ;;  %v308_v9 = vld [vmem:[%s697_s4] ss:$0 sm:$0xff] }
  0x46   :  { %431 = vmatpush3.bf16.msra.mxu0 %v428_v15  ;;  %459 = vmatpush3.bf16.msra.mxu1 %v456_v34 }
  0x47   :  { %433 = vmatprep.subr.bf16.mxu0 %v432_v18  ;;  %461 = vmatprep.subr.bf16.mxu1 %v460_v37 }
  0x4a   :  { %435 = vmatpush3.bf16.msra.mxu0 %v432_v18  ;;  %463 = vmatpush3.bf16.msra.mxu1 %v460_v37 }
  0x4b   :  { %437 = vmatprep.subr.bf16.mxu0 %v436_v21  ;;  %465 = vmatprep.subr.bf16.mxu1 %v464_v41 }
  0x4e   :  { %439 = vmatpush3.bf16.msra.mxu0 %v436_v21  ;;  %467 = vmatpush3.bf16.msra.mxu1 %v464_v41 }
  0x4f   :  { %441 = vmatprep.subr.bf16.mxu0 %v440_v24  ;;  %469 = vmatprep.subr.bf16.mxu1 %v468_v43 }
  0x52   :  { %443 = vmatpush3.bf16.msra.mxu0 %v440_v24  ;;  %471 = vmatpush3.bf16.msra.mxu1 %v468_v43 }
  0x53   :  { %445 = vmatprep.subr.bf16.mxu0 %v444_v27  ;;  %473 = vmatprep.subr.bf16.mxu1 %v472_v46 }
  0x56   :  { %447 = vmatpush3.bf16.msra.mxu0 %v444_v27  ;;  %475 = vmatpush3.bf16.msra.mxu1 %v472_v46 }
  0x57   :  { %477 = vmatprep.subr.bf16.mxu1 %v476_v49 }
  0x59   :  { %379 = vmatmul.mubr.f32.vlgmr.msra.gmra.mrb[0].mxu0 %v76_v28 }
  0x5a   :  { %479 = vmatpush3.bf16.msra.mxu1 %v476_v49 }
 0x12c   :  { %v380_v51 = vpop.f32.mrb[0].mxu0 }
 0x12d   :  { %v172_v52 = vadd.f32 %v380_v51, %v309_v50  ;;  %v166_v53 = vpop.f32.mrb[1].mxu0 }
 0x12e   :  { %v167_v54 = vadd.f32 %v309_v50, %v166_v53 }
 0x12f   :  { %v178_v55 = vmul.f32 %v172_v52, %v172_v52  ;;  %v176_v6 = vmul.f32 0.5, %v172_v52 }
 0x130   :  { %v177_v56 = vmul.f32 %v167_v54, %v167_v54  ;;  %v175_v4 = vmul.f32 0.5, %v167_v54 }
 0x131   :  { %v180_v57 = vmul.f32 %v178_v55, %v172_v52 }
 0x132   :  { %v179_v58 = vmul.f32 %v177_v56, %v167_v54 }
 0x133   :  { %v182_v59 = vmul.f32 0.044715, %v180_v57 }
 0x134   :  { %v181_v60 = vmul.f32 0.044715, %v179_v58 }
 0x135   :  { %v184_v61 = vadd.f32 %v182_v59, %v172_v52 }
 0x136   :  { %v183_v62 = vadd.f32 %v181_v60, %v167_v54 }
 0x137   :  { %v186_v63 = vmul.f32 0.7978846, %v184_v61 }
 0x138   :  { %v185_v0 = vmul.f32 0.7978846, %v183_v62 }
 0x139   :  { %486 = vtanh.f32 %v186_v63 }
 0x13a   :  { %488 = vtanh.f32 %v185_v0 }
 0x143   :  { %v487_v1 = vpop.eup %486 }
 0x144   :  { %v489_v2 = vpop.eup %488  ;;  %v190_v3 = vadd.f32 1.0, %v487_v1 }
 0x145   :  { %v189_v5 = vadd.f32 1.0, %v489_v2 }
 0x146   :  { %v192_v8 = vmul.f32 %v190_v3, %v176_v6 }
 0x147   :  { %v191_v7 = vmul.f32 %v189_v5, %v175_v4 }
 0x149   :  { %413 = vmatprep.mubr.f32.mxu1 %v191_v7 }
 0x14a   :  { %414 = vmatmul.mubr.f32.vlgmr.msra.gmra.mrb[0].mxu1 %v192_v8 }
 0x21d   :  { %v415_v10 = vpop.f32.mrb[0].mxu1 }
 0x21e   :  { %v287_v11 = vadd.f32 %v415_v10, %v308_v9  ;;  %v277_v12 = vpop.f32.mrb[1].mxu1 }
 0x21f   :  { %v286_v13 = vadd.f32 %v308_v9, %v277_v12 }
 0x220   :  { %289 = vst [vmem:[#allocation8 + $0x8] sm:$0xff] %v287_v11 }
 0x221   :  { %288 = vst [vmem:[#allocation8] sm:$0xff] %v286_v13 }
 0x222   :  { %567 = shalt.err (!%p564_p0)
}
 0x223   :  { %s568_s4 = scalar_lea.hbm %s698_s5, 256 }
 0x224   :  { %p569_p1 = scmp.ne.s32.totalorder %s698_s5, %s568_s4  ;;  %p572_p2 = scmp.lt.u32.totalorder %s568_s4, %s698_s5 }
 0x226   :  { %p574_p3 = pnand %p572_p2, %p569_p1 }
 0x228   :  { %577 = shalt.err (!%p574_p3)
}
 0x229   :  { %301 = dma.vmem_to_hbm [thread:$0]  %s296_s9, 256, %s698_s5, [#allocation4], %s586_s30, %s586_s30, %s587_s6  }
 0x22a   :  { %582 = dma.done.wait [#allocation4], 256  }
 0x22b   :  { %583 = vsyncadd [#allocation4], 4294967040 }
 0x22c   :  { %305 = vsyncpa [#allocation3], 1 }
 0x22d   :  { %306 = vsyncpa [#allocation6], 1 }
 0x22e   :  { %307 = vsyncpa [#allocation4], 1 }

</bundles_post_ra>
